<compile_context>
chip_gen: v7x
topology: tpu7x:2x2x1
jax: 0.10.0
libtpu: 0.0.40
codegen_flags: <defaults>
</compile_context>

<pallas_src>
import functools

import jax
import jax.numpy as jnp
from jax import lax
from jax.experimental import pallas as pl
from jax.experimental.pallas import tpu as pltpu


_SQRT_2_OVER_PI = 0.7978845608028654  # sqrt(2/pi)
_GELU_COEFF = 0.044715


def _round_up(x, m):
    return ((x + m - 1) // m) * m


def _siglip_mlp_kernel(x_ref, w_ref, b_ref, o_ref):
    # x_ref: (tm, Hp)  activation tile (compute dtype: f32 or bf16)
    # w_ref: (Ip, Hp)  fc1 weight in torch (out, in) layout, resident across grid
    # b_ref: (1, Ip)   fc1 bias (f32)
    # o_ref: (tm, Ip)  output tile
    x = x_ref[...]
    w = w_ref[...]
    b = b_ref[...]

    # x @ W^T without materializing a transpose: contract last dims of both.
    dn = (((1,), (1,)), ((), ()))

    # fc1 (f32 accumulation on the MXU)
    h = lax.dot_general(x, w, dn, preferred_element_type=jnp.float32) + b

    # gelu(approximate='tanh') in f32: 0.5*x*(1 + tanh(sqrt(2/pi)*(x + 0.044715*x^3)))
    g = 0.5 * h * (1.0 + jnp.tanh(_SQRT_2_OVER_PI * (h + _GELU_COEFF * h * h * h)))

    # fc1 again (as written in the PyTorch forward); cast to matmul compute dtype.
    o = lax.dot_general(g.astype(w.dtype), w, dn,
                        preferred_element_type=jnp.float32) + b
    o_ref[...] = o.astype(o_ref.dtype)


@functools.partial(jax.jit, static_argnames=("use_bf16_matmul",))
def siglip_mlp(hidden_states, fc1_weight, fc1_bias, *, use_bf16_matmul=None):
    """hidden_states: (B, S, H); fc1_weight: (I, H) torch layout; fc1_bias: (I,)."""
    B, S, H = hidden_states.shape
    I, H_w = fc1_weight.shape
    assert H_w == H
    # The double-fc1 forward only shape-checks when I == H (same as in PyTorch).
    assert I == H, "double-fc1 forward requires intermediate_size == hidden_size"

    out_dtype = hidden_states.dtype
    if use_bf16_matmul is None:
        use_bf16_matmul = (out_dtype == jnp.bfloat16)
    compute_dtype = jnp.bfloat16 if use_bf16_matmul else jnp.float32

    M = B * S
    # Lane-dense feature dims (multiples of 128) and sublane-aligned row tile.
    Hp = _round_up(H, 128)
    Ip = _round_up(I, 128)
    tm_target = 512 if compute_dtype == jnp.bfloat16 else 256
    tm = min(tm_target, _round_up(M, 16))
    Mp = _round_up(M, tm)

    # Zero-pad (no-ops for already-aligned production shapes, e.g. H = I = 1152).
    x2 = hidden_states.reshape(M, H).astype(compute_dtype)
    if (Mp, Hp) != (M, H):
        x2 = jnp.pad(x2, ((0, Mp - M), (0, Hp - H)))
    w = fc1_weight.astype(compute_dtype)
    if (Ip, Hp) != (I, H):
        w = jnp.pad(w, ((0, Ip - I), (0, Hp - H)))
    b = fc1_bias.astype(jnp.float32).reshape(1, I)
    if Ip != I:
        b = jnp.pad(b, ((0, 0), (0, Ip - I)))

    xb = jnp.dtype(compute_dtype).itemsize
    ob = jnp.dtype(out_dtype).itemsize

    cost = pl.CostEstimate(
        flops=2 * 2 * Mp * Hp * Ip,          # two matmuls
        transcendentals=Mp * Ip,             # tanh
        bytes_accessed=Mp * Hp * xb + Ip * Hp * xb + Ip * 4 + Mp * Ip * ob,
    )

    # VMEM budget: double-buffered x/out tiles + resident weight/bias + f32
    # intermediates (h, g, o). Clamp to stay within v7x's 64 MiB per-TC VMEM.
    vmem_est = (2 * tm * Hp * xb + 2 * tm * Ip * ob
                + Ip * Hp * xb + 2 * Ip * 4 + 3 * tm * Ip * 4)
    vmem_limit = int(min(48 * 2**20, max(32 * 2**20, 2 * vmem_est)))

    out = pl.pallas_call(
        _siglip_mlp_kernel,
        out_shape=jax.ShapeDtypeStruct((Mp, Ip), out_dtype),
        grid=(Mp // tm,),
        in_specs=[
            pl.BlockSpec((tm, Hp), lambda i: (i, 0)),   # activation tile (pipelined)
            pl.BlockSpec((Ip, Hp), lambda i: (0, 0)),   # weight: resident across grid
            pl.BlockSpec((1, Ip), lambda i: (0, 0)),    # bias: resident across grid
        ],
        out_specs=pl.BlockSpec((tm, Ip), lambda i: (i, 0)),
        compiler_params=pltpu.CompilerParams(
            dimension_semantics=("parallel",),          # shard row tiles across TCs
            vmem_limit_bytes=vmem_limit,
        ),
        cost_estimate=cost,
    )(x2, w, b)

    return out[:M, :I].reshape(B, S, I)


def _reference(hidden_states, fc1_weight, fc1_bias):
    """Plain-JAX reference matching the torch forward exactly."""
    def linear(x, w, bias):
        return jnp.einsum("...h,ih->...i", x, w,
                          precision=lax.Precision.HIGHEST) + bias

    def gelu_tanh(x):
        return 0.5 * x * (1.0 + jnp.tanh(_SQRT_2_OVER_PI * (x + _GELU_COEFF * x ** 3)))

    h = linear(hidden_states, fc1_weight, fc1_bias)
    h = gelu_tanh(h)
    return linear(h, fc1_weight, fc1_bias)


if __name__ == "__main__":
    # Small synthetic config: hidden_size == intermediate_size == 32
    # (required for the double-fc1 forward to be shape-valid).
    B, S, H = 2, 8, 32
    I = H

    key = jax.random.PRNGKey(0)
    kx, kw, kb = jax.random.split(key, 3)

    x = jax.random.normal(kx, (B, S, H), dtype=jnp.float32)
    fc1_weight = jax.random.normal(kw, (I, H), dtype=jnp.float32) * 0.05
    fc1_bias = jax.random.normal(kb, (I,), dtype=jnp.float32) * 0.05

    ref = _reference(x, fc1_weight, fc1_bias)

    # f32 matmul path (default for f32 inputs): tight tolerance.
    out = jax.block_until_ready(siglip_mlp(x, fc1_weight, fc1_bias))
    assert out.shape == (B, S, I), out.shape
    err = float(jnp.max(jnp.abs(out - ref)))
    assert jnp.allclose(out, ref, atol=1e-4, rtol=1e-4), err

    # bf16 matmul path (native MXU rate, f32 accumulation): looser tolerance.
    out_bf = jax.block_until_ready(
        siglip_mlp(x, fc1_weight, fc1_bias, use_bf16_matmul=True))
    err_bf = float(jnp.max(jnp.abs(out_bf.astype(jnp.float32) - ref)))
    assert jnp.allclose(out_bf.astype(jnp.float32), ref, atol=5e-2, rtol=5e-2), err_bf

    print("KERNEL_OK")
</pallas_src>

<mosaic_0001>
module attributes {stable_mosaic.version = 11 : i64} {
  func.func @_siglip_mlp_kernel(%arg0: i32, %arg1: memref<16x128xf32, #tpu.memory_space<vmem>>, %arg2: memref<128x128xf32, #tpu.memory_space<vmem>>, %arg3: memref<1x128xf32, #tpu.memory_space<vmem>>, %arg4: memref<16x128xf32, #tpu.memory_space<vmem>>) attributes {dimension_semantics = [#tpu.dimension_semantics<parallel>], iteration_bounds = array<i64: 1>, scalar_prefetch = 0 : i64, scratch_operands = 0 : i64, tpu.core_type = #tpu.core_type<tc>, window_params = [{transform_indices = @transform_0, window_bounds = array<i64: 16, 128>}, {pipeline_mode = #tpu.pipeline_mode<synchronous>, transform_indices = @transform_1, window_bounds = array<i64: 128, 128>}, {pipeline_mode = #tpu.pipeline_mode<synchronous>, transform_indices = @transform_2, window_bounds = array<i64: 1, 128>}, {transform_indices = @transform_3, window_bounds = array<i64: 16, 128>}]} {
    %c0 = arith.constant 0 : index
    %c0_0 = arith.constant 0 : index
    %0 = vector.load %arg1[%c0, %c0_0] : memref<16x128xf32, #tpu.memory_space<vmem>>, vector<16x128xf32>
    %c0_1 = arith.constant 0 : index
    %c0_2 = arith.constant 0 : index
    %1 = vector.load %arg2[%c0_1, %c0_2] : memref<128x128xf32, #tpu.memory_space<vmem>>, vector<128x128xf32>
    %c0_3 = arith.constant 0 : index
    %c0_4 = arith.constant 0 : index
    %2 = vector.load %arg3[%c0_3, %c0_4] : memref<1x128xf32, #tpu.memory_space<vmem>>, vector<1x128xf32>
    %cst = arith.constant dense<0.000000e+00> : vector<16x128xf32>
    %3 = tpu.matmul %0, %1, %cst {dimension_numbers = #tpu.dot_dimension_numbers<[1], [1], [0], [0], [0, 0, 1, 0], [], []>} : vector<16x128xf32>, vector<128x128xf32>, vector<16x128xf32> -> vector<16x128xf32>
    %4 = vector.broadcast %2 : vector<1x128xf32> to vector<16x128xf32>
    %5 = arith.addf %3, %4 : vector<16x128xf32>
    %cst_5 = arith.constant 5.000000e-01 : f32
    %6 = vector.broadcast %cst_5 : f32 to vector<16x128xf32>
    %7 = arith.mulf %6, %5 : vector<16x128xf32>
    %cst_6 = arith.constant 4.471500e-02 : f32
    %8 = vector.broadcast %cst_6 : f32 to vector<16x128xf32>
    %9 = arith.mulf %8, %5 : vector<16x128xf32>
    %10 = arith.mulf %9, %5 : vector<16x128xf32>
    %11 = arith.mulf %10, %5 : vector<16x128xf32>
    %12 = arith.addf %5, %11 : vector<16x128xf32>
    %cst_7 = arith.constant 0.797884583 : f32
    %13 = vector.broadcast %cst_7 : f32 to vector<16x128xf32>
    %14 = arith.mulf %13, %12 : vector<16x128xf32>
    %15 = math.tanh %14 : vector<16x128xf32>
    %cst_8 = arith.constant 1.000000e+00 : f32
    %16 = vector.broadcast %cst_8 : f32 to vector<16x128xf32>
    %17 = arith.addf %16, %15 : vector<16x128xf32>
    %18 = arith.mulf %7, %17 : vector<16x128xf32>
    %cst_9 = arith.constant dense<0.000000e+00> : vector<16x128xf32>
    %19 = tpu.matmul %18, %1, %cst_9 {dimension_numbers = #tpu.dot_dimension_numbers<[1], [1], [0], [0], [0, 0, 1, 0], [], []>} : vector<16x128xf32>, vector<128x128xf32>, vector<16x128xf32> -> vector<16x128xf32>
    %20 = vector.broadcast %2 : vector<1x128xf32> to vector<16x128xf32>
    %21 = arith.addf %19, %20 : vector<16x128xf32>
    %c0_10 = arith.constant 0 : index
    %c0_11 = arith.constant 0 : index
    %22 = vector.load %arg4[%c0_10, %c0_11] : memref<16x128xf32, #tpu.memory_space<vmem>>, vector<16x128xf32>
    tpu.vector_store %arg4[%c0_10, %c0_11], %21 {strides = array<i32>} : memref<16x128xf32, #tpu.memory_space<vmem>>, vector<16x128xf32>,
    return
  }
  func.func @transform_0(%arg0: i32) -> (i32, i32) {
    %c0_i32 = arith.constant 0 : i32
    %c0_i32_0 = arith.constant 0 : i32
    return %arg0, %c0_i32 : i32, i32
  }
  func.func @transform_1(%arg0: i32) -> (i32, i32) {
    %c0_i32 = arith.constant 0 : i32
    %c0_i32_0 = arith.constant 0 : i32
    %c0_i32_1 = arith.constant 0 : i32
    return %c0_i32, %c0_i32_0 : i32, i32
  }
  func.func @transform_2(%arg0: i32) -> (i32, i32) {
    %c0_i32 = arith.constant 0 : i32
    %c0_i32_0 = arith.constant 0 : i32
    %c0_i32_1 = arith.constant 0 : i32
    return %c0_i32, %c0_i32_0 : i32, i32
  }
  func.func @transform_3(%arg0: i32) -> (i32, i32) {
    %c0_i32 = arith.constant 0 : i32
    %c0_i32_0 = arith.constant 0 : i32
    return %arg0, %c0_i32 : i32, i32
  }
}

</mosaic_0001>

<bundles_post_ra>
// kernel: siglip_mlp.1
= control target key start
LH: loop header
LB: loop body
LE: loop exit
PB: predicated region body
PF: predicated region fallthrough
CT: control target
= control target key end

     0   :  { %s471_s1 = inlined_call_operand.vmem [shape: f32[128,128], index: 1, kind: input, shape index: {}]   ;;  %s472_s0 = inlined_call_operand.vmem [shape: f32[16,128], index: 0, kind: input, shape index: {}]   ;;  %s473_s2 = inlined_call_operand.vmem [shape: f32[1,128], index: 2, kind: input, shape index: {}]   ;;  %s474_s3 = inlined_call_operand.vmem [shape: f32[16,128], index: 3, kind: output, shape index: {}]  }
   0x1   :  { %v16_v0 = vld [vmem:[%s471_s1] sm:$0xff]  ;;  %v17_v1 = vld [vmem:[%s471_s1 + $0x8] sm:$0xff]  ;;  %v18_v2 = vld [vmem:[%s471_s1 + $0x10] sm:$0xff] }
   0x2   :  { %v320_v3 = vpack.c.bf16 %v17_v1, %v16_v0  ;;  %v19_v4 = vld [vmem:[%s471_s1 + $0x18] sm:$0xff]  ;;  %v14_v6 = vld [vmem:[%s472_s0] sm:$0xff]  ;;  %v21_v8 = vld [vmem:[%s471_s1 + $0x28] sm:$0xff] }
   0x3   :  { %v324_v5 = vpack.c.bf16 %v19_v4, %v18_v2  ;;  %v20_v7 = vld [vmem:[%s471_s1 + $0x20] sm:$0xff]  ;;  %282 = vmatprep.mubr.f32.mxu0 %v14_v6  ;;  %v22_v10 = vld [vmem:[%s471_s1 + $0x30] sm:$0xff]  ;;  %v23_v11 = vld [vmem:[%s471_s1 + $0x38] sm:$0xff] }
   0x4   :  { %321 = vmatprep.subr.bf16.mxu0 %v320_v3  ;;  %353 = vmatprep.subr.bf16.mxu1 %v320_v3  ;;  %v328_v9 = vpack.c.bf16 %v21_v8, %v20_v7  ;;  %v332_v12 = vpack.c.bf16 %v23_v11, %v22_v10  ;;  %v24_v13 = vld [vmem:[%s471_s1 + $0x40] sm:$0xff]  ;;  %v25_v14 = vld [vmem:[%s471_s1 + $0x48] sm:$0xff]  ;;  %v26_v16 = vld [vmem:[%s471_s1 + $0x50] sm:$0xff] }
   0x5   :  { %323 = vmatpush3.bf16.xpose.msra.mxu0 %v320_v3  ;;  %355 = vmatpush3.bf16.xpose.msra.mxu1 %v320_v3  ;;  %v336_v15 = vpack.c.bf16 %v25_v14, %v24_v13  ;;  %v27_v17 = vld [vmem:[%s471_s1 + $0x58] sm:$0xff]  ;;  %v28_v19 = vld [vmem:[%s471_s1 + $0x60] sm:$0xff]  ;;  %v29_v20 = vld [vmem:[%s471_s1 + $0x68] sm:$0xff] }
   0x6   :  { %325 = vmatprep.subr.bf16.mxu0 %v324_v5  ;;  %357 = vmatprep.subr.bf16.mxu1 %v324_v5  ;;  %v340_v18 = vpack.c.bf16 %v27_v17, %v26_v16  ;;  %v344_v21 = vpack.c.bf16 %v29_v20, %v28_v19  ;;  %v30_v22 = vld [vmem:[%s471_s1 + $0x70] sm:$0xff]  ;;  %v31_v23 = vld [vmem:[%s471_s1 + $0x78] sm:$0xff]  ;;  %v15_v25 = vld [vmem:[%s472_s0 + $0x8] sm:$0xff] }
   0x7   :  { %v348_v24 = vpack.c.bf16 %v31_v23, %v30_v22  ;;  %v213_v26 = vld [vmem:[%s473_s2] ss:$0 sm:$0xff] }
   0xd   :  { %327 = vmatpush3.bf16.xpose.msra.mxu0 %v324_v5  ;;  %359 = vmatpush3.bf16.xpose.msra.mxu1 %v324_v5 }
   0xe   :  { %329 = vmatprep.subr.bf16.mxu0 %v328_v9  ;;  %361 = vmatprep.subr.bf16.mxu1 %v328_v9 }
  0x15   :  { %331 = vmatpush3.bf16.xpose.msra.mxu0 %v328_v9  ;;  %363 = vmatpush3.bf16.xpose.msra.mxu1 %v328_v9 }
  0x16   :  { %333 = vmatprep.subr.bf16.mxu0 %v332_v12  ;;  %365 = vmatprep.subr.bf16.mxu1 %v332_v12 }
  0x1d   :  { %335 = vmatpush3.bf16.xpose.msra.mxu0 %v332_v12  ;;  %367 = vmatpush3.bf16.xpose.msra.mxu1 %v332_v12 }
  0x1e   :  { %337 = vmatprep.subr.bf16.mxu0 %v336_v15  ;;  %369 = vmatprep.subr.bf16.mxu1 %v336_v15 }
  0x25   :  { %339 = vmatpush3.bf16.xpose.msra.mxu0 %v336_v15  ;;  %371 = vmatpush3.bf16.xpose.msra.mxu1 %v336_v15 }
  0x26   :  { %341 = vmatprep.subr.bf16.mxu0 %v340_v18  ;;  %373 = vmatprep.subr.bf16.mxu1 %v340_v18 }
  0x2d   :  { %343 = vmatpush3.bf16.xpose.msra.mxu0 %v340_v18  ;;  %375 = vmatpush3.bf16.xpose.msra.mxu1 %v340_v18 }
  0x2e   :  { %345 = vmatprep.subr.bf16.mxu0 %v344_v21  ;;  %377 = vmatprep.subr.bf16.mxu1 %v344_v21 }
  0x35   :  { %347 = vmatpush3.bf16.xpose.msra.mxu0 %v344_v21  ;;  %379 = vmatpush3.bf16.xpose.msra.mxu1 %v344_v21 }
  0x36   :  { %349 = vmatprep.subr.bf16.mxu0 %v348_v24  ;;  %381 = vmatprep.subr.bf16.mxu1 %v348_v24 }
  0x3d   :  { %351 = vmatpush3.bf16.xpose.msra.mxu0 %v348_v24  ;;  %383 = vmatpush3.bf16.xpose.msra.mxu1 %v348_v24 }
  0x44   :  { %283 = vmatmul.mubr.f32.vlgmr.msra.gmra.mrb[0].mxu0 %v15_v25 }
 0x117   :  { %v284_v27 = vpop.f32.mrb[0].mxu0 }
 0x118   :  { %v111_v28 = vadd.f32 %v284_v27, %v213_v26  ;;  %v105_v29 = vpop.f32.mrb[1].mxu0 }
 0x119   :  { %v106_v30 = vadd.f32 %v213_v26, %v105_v29 }
 0x11a   :  { %v117_v31 = vmul.f32 0.044715, %v111_v28  ;;  %v115_v46 = vmul.f32 0.5, %v111_v28 }
 0x11b   :  { %v116_v32 = vmul.f32 0.044715, %v106_v30  ;;  %v114_v44 = vmul.f32 0.5, %v106_v30 }
 0x11c   :  { %v119_v33 = vmul.f32 %v117_v31, %v111_v28 }
 0x11d   :  { %v118_v34 = vmul.f32 %v116_v32, %v106_v30 }
 0x11e   :  { %v121_v35 = vmul.f32 %v119_v33, %v111_v28 }
 0x11f   :  { %v120_v36 = vmul.f32 %v118_v34, %v106_v30 }
 0x120   :  { %v123_v37 = vadd.f32 %v121_v35, %v111_v28 }
 0x121   :  { %v122_v38 = vadd.f32 %v120_v36, %v106_v30 }
 0x122   :  { %v125_v39 = vmul.f32 0.7978846, %v123_v37 }
 0x123   :  { %v124_v40 = vmul.f32 0.7978846, %v122_v38 }
 0x124   :  { %384 = vtanh.f32 %v125_v39 }
 0x125   :  { %386 = vtanh.f32 %v124_v40 }
 0x12e   :  { %v385_v41 = vpop.eup %384 }
 0x12f   :  { %v387_v42 = vpop.eup %386  ;;  %v129_v43 = vadd.f32 1.0, %v385_v41 }
 0x130   :  { %v128_v45 = vadd.f32 1.0, %v387_v42 }
 0x131   :  { %v131_v48 = vmul.f32 %v129_v43, %v115_v46 }
 0x132   :  { %v130_v47 = vmul.f32 %v128_v45, %v114_v44 }
 0x134   :  { %317 = vmatprep.mubr.f32.mxu1 %v130_v47 }
 0x135   :  { %318 = vmatmul.mubr.f32.vlgmr.msra.gmra.mrb[0].mxu1 %v131_v48 }
 0x208   :  { %v319_v49 = vpop.f32.mrb[0].mxu1 }
 0x209   :  { %v204_v50 = vadd.f32 %v319_v49, %v213_v26  ;;  %v198_v51 = vpop.f32.mrb[1].mxu1 }
 0x20a   :  { %v199_v52 = vadd.f32 %v213_v26, %v198_v51 }
 0x20b   :  { %208 = vst [vmem:[%s474_s3 + $0x8] sm:$0xff] %v204_v50 }
 0x20c   :  { %207 = vst [vmem:[%s474_s3] sm:$0xff] %v199_v52 }

</bundles_post_ra>
